<compile_context>
chip_gen: v7x
topology: tpu7x:2x2x1
jax: 0.10.0
libtpu: 0.0.40
codegen_flags: <defaults>
</compile_context>

<pallas_src>
import functools

import jax
import jax.numpy as jnp
import numpy as np
from jax.experimental import pallas as pl
from jax.experimental.pallas import tpu as pltpu

C_OUT_PER_PATH = 16
C_OUT_TOTAL = 4 * C_OUT_PER_PATH      # 64
N_TAPS = 6                            # tap offsets 0,4,8,12,16 in padded x + pooled
BN_EPS = 1e-5


def _round_up(x, m):
    return ((x + m - 1) // m) * m


def _inception_kernel(x_ref, w_ref, shift_ref, out_ref, *, l_true):
    """Fused inception block, NCL layout, ONE batched matmul per grid step.

    x_ref     : (B, Cp, Lp+16)  input, zero-padded: 8 halo columns each side plus
                                lane padding up to Lp; channels padded to Cp (8k)
    w_ref     : (64, 6*Cp)      combined weights (BN scale folded in), tap-major
    shift_ref : (64, 1)         folded (conv bias + BatchNorm) shift
    out_ref   : (B, 64, Lp)     columns >= l_true are garbage, sliced off outside
    """
    B, cp, _ = x_ref.shape
    Lp = out_ref.shape[2]
    f32 = jnp.float32

    w = w_ref[...]                      # (64, 6*Cp)
    shift = shift_ref[...]              # (64, 1) -> broadcasts over lanes
    x = x_ref[...]                      # (B, Cp, Lp+16)

    # MaxPool1d(k=3, s=1, p=1): boundary windows must ignore the (zero) padding.
    # Masks are hoisted: computed once per grid step for the whole batch tile and
    # use the TRUE length so lane padding never leaks into the pool.
    col = jax.lax.broadcasted_iota(jnp.int32, (B, cp, Lp), 2)
    neg_inf = jnp.float32(-jnp.inf)

    center = x[:, :, 8:8 + Lp]                                   # (B, Cp, Lp)
    left = jnp.where(col > 0, x[:, :, 7:7 + Lp], neg_inf)
    right = jnp.where(col < l_true - 1, x[:, :, 9:9 + Lp], neg_inf)
    pooled = jnp.maximum(center, jnp.maximum(left, right))       # (B, Cp, Lp)

    # Build the im2col operand for the WHOLE batch tile: per-b tap stacks (6*Cp, Lp)
    # concatenated along the lane axis -> (6*Cp, B*Lp).  With Cp % 8 == 0 and
    # Lp % 128 == 0 every concat is tile-aligned (pure vreg/VMEM placement).
    blocks = []
    for b in range(B):                  # static unroll: slicing/placement only
        xb = x[b]                       # (Cp, Lp+16)
        blocks.append(jnp.concatenate(
            [xb[:, 0:Lp],               # tap offset 0   (conv k=5 tap 0)
             xb[:, 4:4 + Lp],           # tap offset 4   (k=5 tap 1, k=3 tap 0)
             xb[:, 8:8 + Lp],           # tap offset 8   (k=5 tap 2, k=3 tap 1, 1x1)
             xb[:, 12:12 + Lp],         # tap offset 12  (k=5 tap 3, k=3 tap 2)
             xb[:, 16:16 + Lp],         # tap offset 16  (k=5 tap 4)
             pooled[b]],                # pooled "tap"   (conv_pool 1x1)
            axis=0))                    # (6*Cp, Lp)
    stacked = jnp.concatenate(blocks, axis=1)                    # (6*Cp, B*Lp)

    # Single MXU matmul for the entire batch tile + folded bias/BN shift.
    y = jnp.dot(w, stacked, preferred_element_type=f32) + shift  # (64, B*Lp)

    for b in range(B):                  # lane-dense (64, Lp) stores
        out_ref[b] = y[:, b * Lp:(b + 1) * Lp].astype(out_ref.dtype)


@jax.jit
def inception1d_block(x_ncl, w_taps, shift):
    """x_ncl: (N, C_in, L) float32 -> (N, 64, L) float32 (PyTorch NCL layout).

    w_taps : (64, 6, C_in)  BN-folded per-tap weights (tap order: offsets
                            0,4,8,12,16 in the halo-padded input, then pooled)
    shift  : (64,)          folded conv-bias + BN shift
    """
    N, C_in, L = x_ncl.shape
    cp = _round_up(C_in, 8)             # sublane-aligned channel count
    lp = _round_up(L, 128)              # lane-aligned length

    # Batch tile: as large as a conservative VMEM budget allows (blocks are
    # double-buffered by the pipeline), but keep >= 2 grid steps when N >= 2 so
    # v7x's two TensorCores / the DMA pipeline have work to overlap.
    per_b_bytes = 4 * (cp * (lp + 16) + C_OUT_TOTAL * lp)
    budget = 8 * 1024 * 1024
    b_tile = 1
    for cand in (8, 4, 2, 1):
        if cand * per_b_bytes <= budget and (pl.cdiv(N, cand) >= 2 or cand == 1):
            b_tile = cand
            break
    n_pad = pl.cdiv(N, b_tile) * b_tile

    # Single fused pad: batch -> n_pad, channels -> cp, length -> 8-halo + lane pad.
    xc = jnp.pad(x_ncl, ((0, n_pad - N), (0, cp - C_in), (8, 8 + lp - L)))

    # Pad the per-tap channel blocks to cp (zero columns) and flatten tap-major.
    w_comb = jnp.pad(w_taps, ((0, 0), (0, 0), (0, cp - C_in))).reshape(
        C_OUT_TOTAL, N_TAPS * cp)
    shift2 = shift.reshape(C_OUT_TOTAL, 1)

    flops = 2 * C_OUT_TOTAL * N_TAPS * cp * n_pad * lp
    bytes_accessed = 4 * (n_pad * cp * (lp + 16)
                          + n_pad * C_OUT_TOTAL * lp
                          + C_OUT_TOTAL * N_TAPS * cp + C_OUT_TOTAL)

    out = pl.pallas_call(
        functools.partial(_inception_kernel, l_true=L),
        out_shape=jax.ShapeDtypeStruct((n_pad, C_OUT_TOTAL, lp), jnp.float32),
        grid=(n_pad // b_tile,),
        in_specs=[
            pl.BlockSpec((b_tile, cp, lp + 16), lambda n: (n, 0, 0)),
            pl.BlockSpec((C_OUT_TOTAL, N_TAPS * cp), lambda n: (0, 0)),
            pl.BlockSpec((C_OUT_TOTAL, 1), lambda n: (0, 0)),
        ],
        out_specs=pl.BlockSpec((b_tile, C_OUT_TOTAL, lp), lambda n: (n, 0, 0)),
        compiler_params=pltpu.CompilerParams(
            dimension_semantics=("parallel",),
            vmem_limit_bytes=64 * 1024 * 1024),
        cost_estimate=pl.CostEstimate(flops=flops, transcendentals=0,
                                      bytes_accessed=bytes_accessed),
    )(xc, w_comb, shift2)

    return out[:N, :, :L]                                        # (N, 64, L)


# ----------------------------- parameter setup ------------------------------

def make_params(key, c_in):
    """Deterministic synthetic parameters (PyTorch layouts), then fold BN into
    per-tap weights (64, 6, c_in) and a shift (64,)."""
    ks = jax.random.split(key, 24)      # 4 convs x 2 keys + 4 BNs x 4 keys
    it = iter(ks)
    nxt = lambda: next(it)

    def conv_params(kern):
        w = jax.random.normal(nxt(), (C_OUT_PER_PATH, c_in, kern), jnp.float32) * 0.1
        b = jax.random.normal(nxt(), (C_OUT_PER_PATH,), jnp.float32) * 0.1
        return w, b

    def bn_params():
        g = 1.0 + 0.1 * jax.random.normal(nxt(), (C_OUT_PER_PATH,), jnp.float32)
        b = 0.1 * jax.random.normal(nxt(), (C_OUT_PER_PATH,), jnp.float32)
        m = 0.1 * jax.random.normal(nxt(), (C_OUT_PER_PATH,), jnp.float32)
        v = jax.random.uniform(nxt(), (C_OUT_PER_PATH,), jnp.float32, 0.5, 1.5)
        return g, b, m, v

    W1, b1 = conv_params(1); bn1 = bn_params()
    W3, b3 = conv_params(3); bn3 = bn_params()
    W5, b5 = conv_params(5); bn5 = bn_params()
    Wp, bp = conv_params(1); bnp = bn_params()

    def fold(bias, bn):
        g, bb, m, v = bn
        s = g / jnp.sqrt(v + BN_EPS)
        return s, bb + (bias - m) * s

    s1, sh1 = fold(b1, bn1)
    s3, sh3 = fold(b3, bn3)
    s5, sh5 = fold(b5, bn5)
    sp, shp = fold(bp, bnp)

    # Per-tap weights: rows = output channels (concat order p1,p2,p3,p4),
    # tap order = offsets 0,4,8,12,16 in the halo-padded input, then pooled.
    w_taps = jnp.zeros((C_OUT_TOTAL, N_TAPS, c_in), jnp.float32)
    # path1 (1x1): tap at offset 8 -> tap index 2
    w_taps = w_taps.at[0:16, 2].set(W1[:, :, 0] * s1[:, None])
    # path2 (k=3, dil=4, pad=4): taps at offsets 4,8,12 -> tap indices 1,2,3
    for k in range(3):
        w_taps = w_taps.at[16:32, k + 1].set(W3[:, :, k] * s3[:, None])
    # path3 (k=5, dil=4, pad=8): taps at offsets 0,4,8,12,16 -> tap indices 0..4
    for k in range(5):
        w_taps = w_taps.at[32:48, k].set(W5[:, :, k] * s5[:, None])
    # path4 (maxpool + 1x1): pooled tap -> tap index 5
    w_taps = w_taps.at[48:64, 5].set(Wp[:, :, 0] * sp[:, None])

    shift = jnp.concatenate([sh1, sh3, sh5, shp])               # (64,)

    kernel_params = dict(w_taps=w_taps, shift=shift)
    torch_params = dict(W1=W1, b1=b1, bn1=bn1, W3=W3, b3=b3, bn3=bn3,
                        W5=W5, b5=b5, bn5=bn5, Wp=Wp, bp=bp, bnp=bnp)
    return kernel_params, torch_params


def reference_forward(x, p):
    """Pure-JAX reference with PyTorch (eval-mode) semantics, NCL layout."""
    def conv(x, w, b, dil, pad):
        y = jax.lax.conv_general_dilated(
            x, w, window_strides=(1,), padding=[(pad, pad)],
            rhs_dilation=(dil,), dimension_numbers=("NCH", "OIH", "NCH"))
        return y + b[None, :, None]

    def bn(y, bn_p):
        g, b, m, v = bn_p
        return (y - m[None, :, None]) / jnp.sqrt(v[None, :, None] + BN_EPS) \
            * g[None, :, None] + b[None, :, None]

    p1 = bn(conv(x, p["W1"], p["b1"], 1, 0), p["bn1"])
    p2 = bn(conv(x, p["W3"], p["b3"], 4, 4), p["bn3"])
    p3 = bn(conv(x, p["W5"], p["b5"], 4, 8), p["bn5"])
    pooled = jax.lax.reduce_window(x, -jnp.inf, jax.lax.max,
                                   (1, 1, 3), (1, 1, 1),
                                   [(0, 0), (0, 0), (1, 1)])
    p4 = bn(conv(pooled, p["Wp"], p["bp"], 1, 0), p["bnp"])
    return jnp.concatenate([p1, p2, p3, p4], axis=1)


if __name__ == "__main__":
    key = jax.random.PRNGKey(0)
    kx, kp = jax.random.split(key)

    N, C_IN, L = 2, 4, 16
    x = jax.random.normal(kx, (N, C_IN, L), jnp.float32)   # PyTorch NCL input

    kernel_params, torch_params = make_params(kp, C_IN)

    out = inception1d_block(x, kernel_params["w_taps"], kernel_params["shift"])
    out = jax.block_until_ready(out)

    ref = jax.block_until_ready(reference_forward(x, torch_params))

    assert out.shape == (N, 4 * C_OUT_PER_PATH, L), out.shape
    np.testing.assert_allclose(np.asarray(out), np.asarray(ref),
                               rtol=1e-4, atol=1e-4)
    print("KERNEL_OK")
</pallas_src>

<mosaic_0001>
module attributes {stable_mosaic.version = 11 : i64} {
  func.func @_inception_kernel(%arg0: i32, %arg1: memref<1x8x144xf32, #tpu.memory_space<vmem>>, %arg2: memref<64x48xf32, #tpu.memory_space<vmem>>, %arg3: memref<64x1xf32, #tpu.memory_space<vmem>>, %arg4: memref<1x64x128xf32, #tpu.memory_space<vmem>>) attributes {dimension_semantics = [#tpu.dimension_semantics<parallel>], iteration_bounds = array<i64: 2>, scalar_prefetch = 0 : i64, scratch_operands = 0 : i64, tpu.core_type = #tpu.core_type<tc>, window_params = [{transform_indices = @transform_0, window_bounds = array<i64: 1, 8, 144>}, {pipeline_mode = #tpu.pipeline_mode<synchronous>, transform_indices = @transform_1, window_bounds = array<i64: 64, 48>}, {pipeline_mode = #tpu.pipeline_mode<synchronous>, transform_indices = @transform_2, window_bounds = array<i64: 64, 1>}, {transform_indices = @transform_3, window_bounds = array<i64: 1, 64, 128>}]} {
    %c0 = arith.constant 0 : index
    %c0_0 = arith.constant 0 : index
    %0 = vector.load %arg2[%c0, %c0_0] : memref<64x48xf32, #tpu.memory_space<vmem>>, vector<64x48xf32>
    %c0_1 = arith.constant 0 : index
    %c0_2 = arith.constant 0 : index
    %1 = vector.load %arg3[%c0_1, %c0_2] : memref<64x1xf32, #tpu.memory_space<vmem>>, vector<64x1xf32>
    %c0_3 = arith.constant 0 : index
    %c0_4 = arith.constant 0 : index
    %c0_5 = arith.constant 0 : index
    %2 = vector.load %arg1[%c0_3, %c0_4, %c0_5] : memref<1x8x144xf32, #tpu.memory_space<vmem>>, vector<1x8x144xf32>
    %3 = tpu.iota {dimensions = array<i32: 2>} : vector<1x8x128xi32>
    %4 = vector.extract_strided_slice %2 {offsets = [0, 0, 8], sizes = [1, 8, 128], strides = [1, 1, 1]} : vector<1x8x144xf32> to vector<1x8x128xf32>
    %c0_i32 = arith.constant 0 : i32
    %5 = vector.broadcast %c0_i32 : i32 to vector<1x8x128xi32>
    %6 = arith.cmpi sgt, %3, %5 : vector<1x8x128xi32>
    %7 = vector.extract_strided_slice %2 {offsets = [0, 0, 7], sizes = [1, 8, 128], strides = [1, 1, 1]} : vector<1x8x144xf32> to vector<1x8x128xf32>
    %cst = arith.constant 0xFF800000 : f32
    %8 = vector.broadcast %cst : f32 to vector<1x8x128xf32>
    %9 = arith.select %6, %7, %8 : vector<1x8x128xi1>, vector<1x8x128xf32>
    %c15_i32 = arith.constant 15 : i32
    %10 = vector.broadcast %c15_i32 : i32 to vector<1x8x128xi32>
    %11 = arith.cmpi slt, %3, %10 : vector<1x8x128xi32>
    %12 = vector.extract_strided_slice %2 {offsets = [0, 0, 9], sizes = [1, 8, 128], strides = [1, 1, 1]} : vector<1x8x144xf32> to vector<1x8x128xf32>
    %cst_6 = arith.constant 0xFF800000 : f32
    %13 = vector.broadcast %cst_6 : f32 to vector<1x8x128xf32>
    %14 = arith.select %11, %12, %13 : vector<1x8x128xi1>, vector<1x8x128xf32>
    %15 = arith.maximumf %9, %14 : vector<1x8x128xf32>
    %16 = arith.maximumf %4, %15 : vector<1x8x128xf32>
    %17 = vector.shape_cast %2 : vector<1x8x144xf32> to vector<8x144xf32>
    %18 = vector.extract_strided_slice %17 {offsets = [0, 0], sizes = [8, 128], strides = [1, 1]} : vector<8x144xf32> to vector<8x128xf32>
    %19 = vector.extract_strided_slice %17 {offsets = [0, 4], sizes = [8, 128], strides = [1, 1]} : vector<8x144xf32> to vector<8x128xf32>
    %20 = vector.extract_strided_slice %17 {offsets = [0, 8], sizes = [8, 128], strides = [1, 1]} : vector<8x144xf32> to vector<8x128xf32>
    %21 = vector.extract_strided_slice %17 {offsets = [0, 12], sizes = [8, 128], strides = [1, 1]} : vector<8x144xf32> to vector<8x128xf32>
    %22 = vector.extract_strided_slice %17 {offsets = [0, 16], sizes = [8, 128], strides = [1, 1]} : vector<8x144xf32> to vector<8x128xf32>
    %23 = vector.shape_cast %16 : vector<1x8x128xf32> to vector<8x128xf32>
    %24 = tpu.concatenate %18, %19, %20, %21, %22, %23 in 0 : vector<8x128xf32>, vector<8x128xf32>, vector<8x128xf32>, vector<8x128xf32>, vector<8x128xf32>, vector<8x128xf32> -> vector<48x128xf32>
    %cst_7 = arith.constant dense<0.000000e+00> : vector<64x128xf32>
    %25 = tpu.matmul %0, %24, %cst_7 {dimension_numbers = #tpu.dot_dimension_numbers<[1], [0], [0], [1], [0, 0, 1, 1], [], []>} : vector<64x48xf32>, vector<48x128xf32>, vector<64x128xf32> -> vector<64x128xf32>
    %26 = vector.broadcast %1 : vector<64x1xf32> to vector<64x128xf32>
    %27 = arith.addf %25, %26 : vector<64x128xf32>
    %c0_8 = arith.constant 0 : index
    %c0_9 = arith.constant 0 : index
    %c0_10 = arith.constant 0 : index
    %28 = vector.load %arg4[%c0_8, %c0_9, %c0_10] : memref<1x64x128xf32, #tpu.memory_space<vmem>>, vector<1x64x128xf32>
    %29 = vector.shape_cast %28 : vector<1x64x128xf32> to vector<64x128xf32>
    %30 = vector.shape_cast %27 : vector<64x128xf32> to vector<1x64x128xf32>
    tpu.vector_store %arg4[%c0_8, %c0_9, %c0_10], %30 {strides = array<i32>} : memref<1x64x128xf32, #tpu.memory_space<vmem>>, vector<1x64x128xf32>,
    return
  }
  func.func @transform_0(%arg0: i32) -> (i32, i32, i32) {
    %c0_i32 = arith.constant 0 : i32
    %c0_i32_0 = arith.constant 0 : i32
    %c0_i32_1 = arith.constant 0 : i32
    return %arg0, %c0_i32, %c0_i32_0 : i32, i32, i32
  }
  func.func @transform_1(%arg0: i32) -> (i32, i32) {
    %c0_i32 = arith.constant 0 : i32
    %c0_i32_0 = arith.constant 0 : i32
    %c0_i32_1 = arith.constant 0 : i32
    return %c0_i32, %c0_i32_0 : i32, i32
  }
  func.func @transform_2(%arg0: i32) -> (i32, i32) {
    %c0_i32 = arith.constant 0 : i32
    %c0_i32_0 = arith.constant 0 : i32
    %c0_i32_1 = arith.constant 0 : i32
    return %c0_i32, %c0_i32_0 : i32, i32
  }
  func.func @transform_3(%arg0: i32) -> (i32, i32, i32) {
    %c0_i32 = arith.constant 0 : i32
    %c0_i32_0 = arith.constant 0 : i32
    %c0_i32_1 = arith.constant 0 : i32
    return %arg0, %c0_i32, %c0_i32_0 : i32, i32, i32
  }
}

</mosaic_0001>

<bundles_post_ra>
// kernel: inception1d_block.1
= control target key start
LH: loop header
LB: loop body
LE: loop exit
PB: predicated region body
PF: predicated region fallthrough
CT: control target
= control target key end

     0   :  { %8 = vsyncpa [#allocation3], 0  ;;  %s1221_s0 = inlined_call_operand.hbm [shape: f32[2,8,144], index: 0, kind: input, shape index: {}]   ;;  %s1222_s1 = inlined_call_operand.hbm [shape: f32[64,48], index: 1, kind: input, shape index: {}]   ;;  %s1223_s2 = inlined_call_operand.hbm [shape: f32[64,1], index: 2, kind: input, shape index: {}]   ;;  %s1224_s3 = inlined_call_operand.hbm [shape: f32[2,64,128], index: 3, kind: output, shape index: {}]  }
   0x1   :  { %10 = vsyncpa [#allocation3 + $0x1], 0 }
   0x2   :  { %11 = vsyncpa [#allocation6], 0 }
   0x3   :  { %12 = vsyncpa [#allocation4], 0 }
   0x4   :  { %14 = vsyncpa [#allocation4 + $0x1], 0  ;;  %s975_s12 = smov 0   ;;  %s977_s13 = smov 0  }
   0x5   :  { %s979_s14 = smov 0   ;;  %s981_s15 = smov 0  }
   0x6 LB: > { %s996_s16 = sadd.s32 4294967295, %s938_s15   ;;  %s583_s17 = sadd.s32 4294967294, %s938_s15   ;;  %s938_s15 = sphi %s981_s15, %s1244_s15   ;;  %s934_s14 = sphi %s979_s14, %s1243_s14   ;;  %s930_s13 = sphi %s977_s13, %s1242_s13   ;;  %s926_s12 = sphi %s975_s12, %s1241_s12  }
   0x7   : > { %p40_p0 = scmp.ne.s32.totalorder %s930_s13, %s926_s12  ;;  %p1225_p1 = scmp.eq.s32.totalorder %s996_s16, 0 }
   0x8   : > { %p112_p3 = scmp.eq.s32.totalorder %s583_s17, 1  ;;  %p584_p5 = scmp.ge.s32.totalorder %s938_s15, 1 }
   0x9   : > { %p1005_p4 = por %p1225_p1, %p40_p0  ;;  %p119_p7 = scmp.lt.s32.totalorder %s938_s15, 3 }
   0xa   : > { %p1010_p6 = por %p112_p3, %p40_p0  ;;  %s940_s21 = smov [#allocation5]  }
   0xb   : > { %s1228_s18 = scalar_select %p1005_p4, 1, 0 }
   0xc   : > { %s1229_s19 = scalar_select %p1010_p6, 1, 0 }
   0xd   : > { %p1015_p8 = pnand %p584_p5, %p119_p7  ;;  %s131_s22 = sshll.u32 %s940_s21, 4  ;;  %s1019_s22 = int_to_ptr.vmem [resolvable:$true] %s131_s22 }
   0xe   : > { %s941_s24 = smov [#allocation7]   ;;  %s782_s28 = scalar_lea.hbm %s1222_s1, 1024 }
   0xf   : > { %p679_p9 = pneg %p1015_p8  ;;  %s144_s25 = sshll.u32 %s941_s24, 4  ;;  %s1030_s25 = int_to_ptr.vmem [resolvable:$true] %s144_s25 }
  0x10   : > { %p783_p12 = scmp.ne.s32.totalorder %s1222_s1, %s782_s28  ;;  %p789_p5 = scmp.lt.u32.totalorder %s782_s28, %s1222_s1 }
  0x11   : > { %p1026_p11 = pnand %p679_p9, %p1225_p1 }
  0x13   : > { %p784_p13 = pneg %p1026_p11 }
  0x15   : > { %p785_p0 = pnand %p784_p13, %p783_p12 }
  0x17   : > { %p786_p3 = pneg %p785_p0 }
  0x19   : > { %p791_p7 = pnand %p789_p5, %p786_p3 }
  0x1b   : > { %794 = shalt.err (!%p791_p7)
}
  0x1c   : > { %s795_s6 = scalar_lea.vmem %s1019_s22, 1024  ;;  %p803_p2 = scmp.lt.s32.totalorder %s1019_s22, %s1019_s22 }
  0x1d   : > { %p796_p9 = scmp.ne.s32.totalorder %s1019_s22, %s795_s6  ;;  %p804_p12 = scmp.lt.s32.totalorder %s795_s6, %s795_s6 }
  0x1f   : > { %p798_p10 = pnand %p796_p9, %p784_p13  ;;  %p805_p0 = por %p804_p12, %p803_p2 }
  0x21   : > { %p799_p1 = pneg %p798_p10 }
  0x23   : > { %p806_p6 = pnand %p805_p0, %p799_p1 }
  0x25   : > { %809 = shalt.err (!%p806_p6)
}
  0x26   : > { %s942_s7 = smov 128   ;;  %s943_s8 = smov 8  }
  0x27   : > { %682 = dma.hbm_to_vmem [thread:$0]  (!%p1026_p11), %s1222_s1, 1024, %s1019_s22, [#allocation6], %s942_s7, %s942_s7, %s943_s8  }
  0x28   : > { %s810_s21 = scalar_lea.hbm %s1223_s2, 1024 }
  0x29   : > { %p811_p2 = scmp.ne.s32.totalorder %s1223_s2, %s810_s21  ;;  %p817_p10 = scmp.lt.u32.totalorder %s810_s21, %s1223_s2 }
  0x2b   : > { %p813_p1 = pnand %p811_p2, %p784_p13 }
  0x2d   : > { %p814_p6 = pneg %p813_p1 }
  0x2f   : > { %p819_p3 = pnand %p817_p10, %p814_p6 }
  0x31   : > { %822 = shalt.err (!%p819_p3)
}
  0x32   : > { %s823_s22 = scalar_lea.vmem %s1030_s25, 1024  ;;  %p831_p12 = scmp.lt.s32.totalorder %s1030_s25, %s1030_s25 }
  0x33   : > { %p824_p5 = scmp.ne.s32.totalorder %s1030_s25, %s823_s22  ;;  %p832_p0 = scmp.lt.s32.totalorder %s823_s22, %s823_s22 }
  0x35   : > { %p826_p7 = pnand %p824_p5, %p784_p13  ;;  %p833_p2 = por %p832_p0, %p831_p12 }
  0x37   : > { %p827_p9 = pneg %p826_p7 }
  0x39   : > { %p834_p1 = pnand %p833_p2, %p827_p9 }
  0x3b   : > { %837 = shalt.err (!%p834_p1)
}
  0x3c   : > { %685 = dma.hbm_to_vmem [thread:$0]  (!%p1026_p11), %s1223_s2, 1024, %s1030_s25, [#allocation6], %s942_s7, %s942_s7, %s943_s8  }
  0x3d   : > { %s1085_s4 = sadd.s32 1, %s938_s15   ;;  %s27_s23 = sadd.s32 1, %s934_s14 }
  0x3e   : > { %s24_s5 = ssub.s32 %s938_s15, %s1085_s4  ;;  %p34_p13 = scmp.ne.s32.totalorder %s934_s14, %s930_s13 }
  0x3f   : > { %p25_p6 = scmp.eq.s32.totalorder %s24_s5, 0  ;;  %p35_p10 = scmp.eq.s32.totalorder %s938_s15, 0 }
  0x40   : > { %p1232_p3 = scmp.eq.s32.totalorder %s996_s16, 1  ;;  %p696_p7 = scmp.lt.s32.totalorder %s938_s15, 2 }
  0x41   : > { %s1101_s9 = scalar_select %p25_p6, %s934_s14, %s27_s23  }
  0x42   : > { %p1095_p5 = por %p1232_p3, %p34_p13  ;;  %p36_p9 = por %p35_p10, %p34_p13 }
  0x43   : > { %s158_s10 = sand.u32 1, %s934_s14   ;;  %s609_s25 = sshll.u32 %s938_s15, 8 }
  0x44   : > { %s1233_s6 = scalar_select %p1095_p5, 1, 0 }
  0x45   : > { %s588_s11 = sshll.u32 %s158_s10, 4  ;;  %s1108_s17 = scalar_lea.hbm %s1221_s0, %s609_s25 }
  0x46   : > { %s162_s21 = scalar_lea.vmem [#allocation2], %s588_s11  ;;  %p1112_p11 = pnand %p696_p7, %p36_p9 }
  0x47   : > { %s170_s24 = sshll.u32 %s162_s21, 4  ;;  %s159_s27 = scalar_lea.sflag [#allocation3], %s158_s10  ;;  %s1110_s24 = int_to_ptr.vmem [resolvable:$true] %s170_s24 }
  0x48   : > { %s838_s28 = scalar_lea.hbm %s1108_s17, 256  ;;  %p840_p0 = pneg %p1112_p11 }
  0x49   : > { %p839_p12 = scmp.ne.s32.totalorder %s1108_s17, %s838_s28  ;;  %s843_s30 = scalar_lea.hbm %s1221_s0, 512 }
  0x4a   : > { %p844_p13 = scmp.lt.u32.totalorder %s1108_s17, %s1221_s0  ;;  %p845_p6 = scmp.lt.u32.totalorder %s843_s30, %s838_s28 }
  0x4b   : > { %p841_p2 = pnand %p840_p0, %p839_p12  ;;  %p847_p3 = scmp.lt.u32.totalorder %s838_s28, %s1108_s17 }
  0x4c   : > { %p846_p10 = por %p845_p6, %p844_p13 }
  0x4d   : > { %p842_p1 = pneg %p841_p2 }
  0x4e   : > { %p848_p7 = por %p847_p3, %p846_p10 }
  0x50   : > { %p849_p9 = pnand %p848_p7, %p842_p1 }
  0x52   : > { %852 = shalt.err (!%p849_p9)
}
  0x53   : > { %s853_s10 = scalar_lea.vmem %s1110_s24, 256  ;;  %s944_s11 = smov [#allocation2]  }
  0x54   : > { %p854_p12 = scmp.ne.s32.totalorder %s1110_s24, %s853_s10  ;;  %s858_s25 = sshll.u32 %s944_s11, 4  ;;  %s859_s25 = int_to_ptr.vmem [resolvable:$false] %s858_s25 }
  0x55   : > { %s860_s7 = scalar_lea.vmem %s859_s25, 512  ;;  %p861_p4 = scmp.lt.s32.totalorder %s1110_s24, %s859_s25 }
  0x56   : > { %p856_p2 = pnand %p854_p12, %p840_p0  ;;  %p862_p13 = scmp.lt.s32.totalorder %s860_s7, %s853_s10 }
  0x58   : > { %p857_p5 = pneg %p856_p2  ;;  %p863_p6 = por %p862_p13, %p861_p4 }
  0x5a   : > { %p864_p10 = pnand %p863_p6, %p857_p5 }
  0x5c   : > { %867 = shalt.err (!%p864_p10)
}
  0x5d   : > { %689 = dma.hbm_to_vmem [thread:$0]  (!%p1112_p11), %s1108_s17, 256, %s1110_s24, %s159_s27  }
  0x5e   : > { %179 = sbr.rel (%p1015_p8) target bundleno = 710 (0x2c6), region = 32  ;;  %s1144_s8 = sand.u32 (!%p1015_p8), 1, %s930_s13  }
  0x5f   : > { %s592_s21 = sshll.u32 (!%p1015_p8), %s1144_s8, 4  ;;  %s182_s28 = scalar_lea.sflag (!%p1015_p8), [#allocation3], %s1144_s8 }
  0x60   : > { %s185_s22 = scalar_lea.vmem (!%p1015_p8), [#allocation2], %s592_s21  ;;  %p1235_p4 = scmp.ne.s32.totalorder (!%p1015_p8), %s1228_s18, 0 }
  0x65   : > { %913 = dma.done.wait (%p1235_p4), %s182_s28, 256  }
  0x66   : > { %915 = vsyncadd (%p1235_p4), %s182_s28, 4294967040  ;;  %p1236_p5 = scmp.eq.s32.totalorder %s996_s16, 0 }
  0x68   : > { %917 = dma.done.wait (%p1236_p5), [#allocation6], 2048   ;;  %p1237_p11 = pmov %p1236_p5 }
  0x69   : > { %v232_v0 = vld [vmem:[%s185_s22] sm:$0xff]  ;;  %v233_v1 = vld [vmem:[%s185_s22 + $0x8] sm:$0xff]  ;;  %s945_s20 = smov 121   ;;  %s946_s17 = smov 119   ;;  %v234_v3 = vlaneseq  ;;  %vm243_vm0 = vcmask 990208   ;;  %vm252_vm2 = vcmask 973824  }
  0x6a   : > { %919 = vsyncadd (%p1237_p11), [#allocation6], 4294965248  ;;  %v745_v2 = vpack.i.bf16 %v233_v1, %v232_v0  ;;  %s947_s24 = smov 120   ;;  %s948_s18 = smov 112   ;;  %v216_v16 = vld [vmem:[#allocation5] sm:$0xff]  ;;  %vm339_vm4 = vcmask 392192  }
  0x6b   : > { %v235_v5 = vand.u32 127, %v234_v3  ;;  %s949_s26 = smov 8   ;;  %s950_s27 = smov 124   ;;  %v220_v17 = vld [vmem:[#allocation5 + $0x20] sm:$0xff]  ;;  %637 = vmatprep.mubr.msk.f32.mxu0 %vm339_vm4, %v216_v16  ;;  %vm267_vm5 = vcmask 1014784   ;;  %vm274_vm6 = vcmask 982016  }
  0x6c   : > { %746 = vrot.lane.b32.xlu0 %v745_v2, %s945_s20  ;;  %s951_s29 = smov 116   ;;  %643 = vmatprep.mubr.msk.f32.mxu1 %vm339_vm4, %v220_v17  ;;  %v224_v28 = vld [vmem:[#allocation7] sm:$0xff]  ;;  %v952_v29 = vmov 0   ;;  %v225_v30 = vld [vmem:[#allocation7 + $0x8] sm:$0xff]  ;;  %vm281_vm7 = vcmask 949248   ;;  %v227_v37 = vld [vmem:[#allocation7 + $0x18] sm:$0xff] }
  0x6d   : > { %vm236_vm1 = vcmp.gt.s32.totalorder %v235_v5, 0  ;;  %vm247_vm3 = vcmp.lt.s32.totalorder %v235_v5, 15  ;;  %781 = vset.pattern.permute.xlu1 %v952_v29  ;;  %780 = vset.pattern.permute.xlu0 %v952_v29  ;;  %v226_v38 = vld [vmem:[#allocation7 + $0x10] sm:$0xff]  ;;  %v229_v41 = vld [vmem:[#allocation7 + $0x28] sm:$0xff]  ;;  %v228_v42 = vld [vmem:[#allocation7 + $0x20] sm:$0xff]  ;;  %vm288_vm8 = vcmask 916480  }
  0x6e   : > { %v231_v43 = vld [vmem:[#allocation7 + $0x38] sm:$0xff]  ;;  %v230_v44 = vld [vmem:[#allocation7 + $0x30] sm:$0xff]  ;;  %v217_v54 = vld [vmem:[#allocation5 + $0x8] sm:$0xff]  ;;  %s595_s30 = sshll.u32 %s1144_s8, 6  ;;  %s610_s10 = sshll.u32 %s996_s16, 10 }
  0x6f   : > { %v221_v55 = vld [vmem:[#allocation5 + $0x28] sm:$0xff]  ;;  %v218_v56 = vld [vmem:[#allocation5 + $0x10] sm:$0xff]  ;;  %v219_v58 = vld [vmem:[#allocation5 + $0x18] sm:$0xff]  ;;  %s215_s23 = scalar_lea.vmem [#allocation8], %s595_s30  ;;  %s1176_s16 = scalar_lea.hbm %s1224_s3, %s610_s10 }
  0x70   : > { %751 = vrot.lane.b32.xlu0 %v745_v2, %s946_s17  ;;  %v222_v57 = vld [vmem:[#allocation5 + $0x30] sm:$0xff]  ;;  %v223_v59 = vld [vmem:[#allocation5 + $0x38] sm:$0xff]  ;;  %s491_s5 = sshll.u32 %s215_s23, 4  ;;  %s478_s7 = scalar_lea.sflag [#allocation4], %s1144_s8  ;;  %s1171_s5 = int_to_ptr.vmem [resolvable:$true] %s491_s5 }
  0x71   : > { %s868_s21 = scalar_lea.vmem %s1171_s5, 1024  ;;  %p1238_p0 = scmp.ne.s32.totalorder %s1233_s6, 0 }
  0x72   : > { %p869_p8 = scmp.ne.s32.totalorder %s1171_s5, %s868_s21  ;;  %s953_s28 = smov [#allocation8]  }
  0x73   : > { %s872_s22 = sshll.u32 %s953_s28, 4  ;;  %s873_s22 = int_to_ptr.vmem [resolvable:$false] %s872_s22 }
  0x74   : > { %761 = vrot.lane.b32.xlu0 %v745_v2, %s947_s24  ;;  %p870_p1 = pnand %p869_p8, %p1238_p0  ;;  %s874_s20 = scalar_lea.vmem %s873_s22, 2048 }
  0x75   : > { %p875_p7 = scmp.lt.s32.totalorder %s1171_s5, %s873_s22  ;;  %p876_p9 = scmp.lt.s32.totalorder %s874_s20, %s868_s21 }
  0x76   : > { %p871_p3 = pneg %p870_p1 }
  0x77   : > { %p877_p12 = por %p876_p9, %p875_p7 }
  0x78   : > { %771 = vrot.lane.b32.xlu0 %v745_v2, %s948_s18 }
  0x79   : > { %p878_p2 = pnand %p877_p12, %p871_p3 }
  0x7c   : > { %301 = vperm.xlu0 %780, %v224_v28  }
  0x80   : > { %316 = vperm.xlu0 %780, %v227_v37  }
  0x84   : > { %326 = vperm.xlu0 %780, %v229_v41  }
  0x88   : > { %336 = vperm.xlu0 %780, %v231_v43  }
  0xde   : > { %v747_v4 = vpop.permute.xlu0 %746 }
  0xdf   : > { %v749_v6 = vunpack.i.h.bf16 %v747_v4  ;;  %v748_v7 = vunpack.i.l.bf16 %v747_v4 }
  0xe1   : > { %v244_v11 = vsel %vm243_vm0, %v748_v7, %v749_v6 }
  0xe2   : > { %v752_v8 = vpop.permute.xlu0 %751  ;;  %v246_v13 = vsel %vm236_vm1, %v244_v11, -inf }
  0xe3   : > { %v754_v9 = vunpack.i.h.bf16 %v752_v8  ;;  %v753_v10 = vunpack.i.l.bf16 %v752_v8 }
  0xe5   : > { %v253_v12 = vsel %vm252_vm2, %v753_v10, %v754_v9 }
  0xe6   : > { %v255_v14 = vsel %vm247_vm3, %v253_v12, -inf  ;;  %v762_v21 = vpop.permute.xlu0 %761 }
  0xe7   : > { %v256_v15 = vmax.f32 %v246_v13, %v255_v14  ;;  %v764_v24 = vunpack.i.h.bf16 %v762_v21  ;;  %v763_v27 = vunpack.i.l.bf16 %v762_v21 }
  0xe9   : > { %258 = vrot.lane.b32.xlu1 %v256_v15, %s949_s26  ;;  %v275_v34 = vsel %vm274_vm6, %v763_v27, %v764_v24 }
  0xea   : > { %v772_v45 = vpop.permute.xlu0 %771 }
  0xeb   : > { %v774_v46 = vunpack.i.h.bf16 %v772_v45  ;;  %v773_v47 = vunpack.i.l.bf16 %v772_v45 }
  0xed   : > { %756 = vrot.lane.b32.xlu1 %v745_v2, %s950_s27  ;;  %v289_v49 = vsel %vm288_vm8, %v773_v47, %v774_v46 }
  0xf1   : > { %766 = vrot.lane.b32.xlu1 %v745_v2, %s951_s29 }
  0xfb   : > { %v302_v61 = vpop.permute.xlu0 %301 }
  0xff   : > { %v317_v63 = vpop.permute.xlu0 %316 }
 0x15b   : > { %v259_v18 = vpop.permute.xlu1 %258 }
 0x15c   : > { %v261_v19 = vmax.f32 %v232_v0, %v259_v18  ;;  %v262_v20 = vmax.f32 %v233_v1, %v259_v18  ;;  %v327_v1 = vpop.permute.xlu0 %326 }
 0x15e   : > { %v775_v22 = vpack.i.bf16 %v262_v20, %v261_v19 }
 0x15f   : > { %v757_v23 = vpop.permute.xlu1 %756 }
 0x160   : > { %776 = vrot.lane.b32.xlu1 %v775_v22, %s947_s24  ;;  %v759_v25 = vunpack.i.h.bf16 %v757_v23  ;;  %v758_v26 = vunpack.i.l.bf16 %v757_v23  ;;  %v337_v11 = vpop.permute.xlu0 %336 }
 0x162   : > { %v268_v31 = vsel %vm267_vm5, %v758_v26, %v759_v25 }
 0x163   : > { %v649_v32 = vpack.c.bf16 %v268_v31, %v232_v0  ;;  %v767_v33 = vpop.permute.xlu1 %766 }
 0x164   : > { %v769_v35 = vunpack.i.h.bf16 %v767_v33  ;;  %v768_v36 = vunpack.i.l.bf16 %v767_v33  ;;  %306 = vperm.xlu1 %781, %v225_v30  }
 0x165   : > { %650 = vmatprep.subr.bf16.mxu0 %v649_v32  ;;  %661 = vmatprep.subr.bf16.mxu1 %v649_v32 }
 0x166   : > { %v282_v39 = vsel %vm281_vm7, %v768_v36, %v769_v35  ;;  %652 = vmatpush3.bf16.msra.mxu0 %v649_v32  ;;  %664 = vmatpush3.bf16.msra.mxu1 %v649_v32 }
 0x167   : > { %v653_v40 = vpack.c.bf16 %v282_v39, %v275_v34 }
 0x168   : > { %311 = vperm.xlu1 %781, %v226_v38  }
 0x169   : > { %654 = vmatprep.subr.bf16.mxu0 %v653_v40  ;;  %662 = vmatprep.subr.bf16.mxu1 %v653_v40 }
 0x16a   : > { %656 = vmatpush3.bf16.msra.mxu0 %v653_v40  ;;  %665 = vmatpush3.bf16.msra.mxu1 %v653_v40 }
 0x16c   : > { %321 = vperm.xlu1 %781, %v228_v42  }
 0x170   : > { %331 = vperm.xlu1 %781, %v230_v44  }
 0x1d2   : > { %v777_v48 = vpop.permute.xlu1 %776 }
 0x1d3   : > { %v779_v50 = vunpack.i.h.bf16 %v777_v48  ;;  %v778_v51 = vunpack.i.l.bf16 %v777_v48 }
 0x1d5   : > { %v297_v52 = vsel %vm274_vm6, %v778_v51, %v779_v50 }
 0x1d6   : > { %v657_v53 = vpack.c.bf16 %v297_v52, %v289_v49 }
 0x1d8   : > { %658 = vmatprep.subr.bf16.mxu0 %v657_v53  ;;  %663 = vmatprep.subr.bf16.mxu1 %v657_v53 }
 0x1d9   : > { %660 = vmatpush3.bf16.msra.mxu0 %v657_v53  ;;  %666 = vmatpush3.bf16.msra.mxu1 %v657_v53 }
 0x1dc   : > { %638 = vmatmul.mubr.msk.f32.vlgmr.msra.gmra.mrb[0].mxu0 %vm339_vm4, %v217_v54  ;;  %644 = vmatmul.mubr.msk.f32.vlgmr.msra.gmra.mrb[0].mxu1 %vm339_vm4, %v221_v55 }
 0x1dd   : > { %640 = vmatprep.mubr.msk.f32.mxu0 %vm339_vm4, %v218_v56  ;;  %646 = vmatprep.mubr.msk.f32.mxu1 %vm339_vm4, %v222_v57 }
 0x1e0   : > { %641 = vmatmul.mubr.msk.f32.gmra.mrb[2].mxu0 %vm339_vm4, %v219_v58  ;;  %647 = vmatmul.mubr.msk.f32.gmra.mrb[2].mxu1 %vm339_vm4, %v223_v59 }
 0x1e3   : > { %v307_v60 = vpop.permute.xlu1 %306 }
 0x1e7   : > { %v312_v62 = vpop.permute.xlu1 %311 }
 0x1eb   : > { %v322_v0 = vpop.permute.xlu1 %321 }
 0x1ef   : > { %v332_v10 = vpop.permute.xlu1 %331 }
 0x2af   : > { %v639_v2 = vpop.f32.mrb[0].mxu0  ;;  %v645_v3 = vpop.f32.mrb[0].mxu1 }
 0x2b0   : > { %v436_v4 = vadd.f32 %v639_v2, %v307_v60  ;;  %v456_v5 = vadd.f32 %v645_v3, %v327_v1  ;;  %v430_v6 = vpop.f32.mrb[1].mxu0  ;;  %v450_v7 = vpop.f32.mrb[1].mxu1 }
 0x2b1   : > { %v431_v8 = vadd.f32 %v430_v6, %v302_v61  ;;  %v451_v9 = vadd.f32 %v450_v7, %v322_v0 }
 0x2b2   : > { %470 = vst [vmem:[%s215_s23 + $0x8] sm:$0xff] %v436_v4  ;;  %474 = vst [vmem:[%s215_s23 + $0x28] sm:$0xff] %v456_v5 }
 0x2b3   : > { %469 = vst [vmem:[%s215_s23] sm:$0xff] %v431_v8  ;;  %473 = vst [vmem:[%s215_s23 + $0x20] sm:$0xff] %v451_v9  ;;  %v642_v12 = vpop.f32.mrb[2].mxu0  ;;  %v648_v13 = vpop.f32.mrb[2].mxu1 }
 0x2b4   : > { %v446_v14 = vadd.f32 %v642_v12, %v317_v63  ;;  %v466_v15 = vadd.f32 %v648_v13, %v337_v11  ;;  %v440_v16 = vpop.f32.mrb[3].mxu0  ;;  %v460_v17 = vpop.f32.mrb[3].mxu1 }
 0x2b5   : > { %v441_v18 = vadd.f32 %v440_v16, %v312_v62  ;;  %v461_v19 = vadd.f32 %v460_v17, %v332_v10 }
 0x2b6   : > { %472 = vst [vmem:[%s215_s23 + $0x18] sm:$0xff] %v446_v14  ;;  %476 = vst [vmem:[%s215_s23 + $0x38] sm:$0xff] %v466_v15 }
 0x2b7   : > { %471 = vst [vmem:[%s215_s23 + $0x10] sm:$0xff] %v441_v18  ;;  %475 = vst [vmem:[%s215_s23 + $0x30] sm:$0xff] %v461_v19 }
 0x2b8   : > { %881 = shalt.err (!%p878_p2)
}
 0x2b9   : > { %s882_s17 = scalar_lea.hbm %s1176_s16, 1024  ;;  %s886_s27 = scalar_lea.hbm %s1224_s3, 2048 }
 0x2ba   : > { %p883_p13 = scmp.ne.s32.totalorder %s1176_s16, %s882_s17  ;;  %p887_p4 = scmp.lt.u32.totalorder %s1176_s16, %s1224_s3 }
 0x2bb   : > { %p888_p5 = scmp.lt.u32.totalorder %s886_s27, %s882_s17  ;;  %p890_p8 = scmp.lt.u32.totalorder %s882_s17, %s1176_s16 }
 0x2bc   : > { %p884_p6 = pnand %p883_p13, %p1238_p0 }
 0x2bd   : > { %p889_p11 = por %p888_p5, %p887_p4 }
 0x2be   : > { %p885_p10 = pneg %p884_p6 }
 0x2bf   : > { %p891_p1 = por %p890_p8, %p889_p11 }
 0x2c1   : > { %p892_p3 = pnand %p891_p1, %p885_p10 }
 0x2c3   : > { %895 = shalt.err (!%p892_p3)
}
 0x2c4   : > { %s954_s23 = smov 128  }
 0x2c5   : > { %677 = dma.vmem_to_hbm [thread:$0]  (%p1238_p0), %s1171_s5, 1024, %s1176_s16, %s478_s7, %s954_s23, %s954_s23, %s949_s26  }
 0x2c6 PF: > { %s506_s10 = sand.u32 1, %s926_s12   ;;  %p1239_p7 = scmp.ne.s32.totalorder %s1229_s19, 0 }
 0x2c7   : > { %p1240_p9 = scmp.ge.s32.totalorder %s938_s15, 2  ;;  %s507_s11 = scalar_lea.sflag [#allocation4], %s506_s10 }
 0x2c9   : > { %p691_p12 = pnand %p1240_p9, %p1239_p7 }
 0x2cb   : > { %921 = dma.done.wait (!%p691_p12), %s507_s11, 1024  }
 0x2cc   : > { %923 = vsyncadd (!%p691_p12), %s507_s11, 4294966272  ;;  %p17_p2 = scmp.ge.s32.totalorder %s1085_s4, 4   ;;  %s1241_s12 = smov %s930_s13 }
 0x2cd   : > { %s1242_s13 = smov %s934_s14  ;;  %s1243_s14 = smov %s1101_s9 }
 0x2ce   : > { %s1244_s15 = smov %s1085_s4  ;;  %19 = sbr.rel (!%p17_p2) target bundleno = 6 (0x6), region = 85 }
 0x2d5   :  { %512 = vsyncpa [#allocation3], 1 }
 0x2d6   :  { %514 = vsyncpa [#allocation3 + $0x1], 1 }
 0x2d7   :  { %515 = vsyncpa [#allocation6], 1 }
 0x2d8   :  { %516 = vsyncpa [#allocation4], 1 }
 0x2d9   :  { %518 = vsyncpa [#allocation4 + $0x1], 1 }

</bundles_post_ra>
